<compile_context>
chip_gen: v6e
topology: v6e:2x2x1
jax: 0.10.0
libtpu: 0.0.40
codegen_flags: <defaults>
</compile_context>

<pallas_src>
import jax
import jax.numpy as jnp
from jax import lax
from jax.experimental import pallas as pl
from jax.experimental.pallas import tpu as pltpu


def _make_mha_kernel(H, D, scale):
    HD = H * D

    def kernel(x_ref, w_ref, o_ref):
        # x_ref : (Bb, T, C)       -- a block of batch elements
        # w_ref : (C, 3*H*D)       -- fused [Wq | Wk | Wv] projection
        # o_ref : (Bb, T, H*D)     -- final layout (concat over heads on last dim)
        Bb, T, C = x_ref.shape
        x = x_ref[...]
        w = w_ref[...]

        # Fused QKV projection for all heads at once (lane-dense N = 3*H*D).
        # Broadcast the weight over the batch dim so this is a plain batched
        # matmul (same pattern Mosaic lowers for flash attention).
        wb = jnp.broadcast_to(w[None], (Bb, C, 3 * HD))
        qkv = jnp.einsum("btc,bcn->btn", x, wb,
                         preferred_element_type=jnp.float32)      # (Bb, T, 3*H*D)

        # Causal mask shared by all heads.
        row = lax.broadcasted_iota(jnp.int32, (T, T), 0)
        col = lax.broadcasted_iota(jnp.int32, (T, T), 1)
        causal = (row >= col)[None]                               # (1, T, T)

        for h in range(H):  # static unroll; heads share the qkv block in VMEM
            qh = qkv[:, :, h * D:(h + 1) * D]                     # (Bb, T, D)
            kh = qkv[:, :, HD + h * D:HD + (h + 1) * D]           # (Bb, T, D)
            vh = qkv[:, :, 2 * HD + h * D:2 * HD + (h + 1) * D]   # (Bb, T, D)

            # q @ k^T contracting on D — no materialized transpose of k.
            s = jnp.einsum("btd,bsd->bts", qh, kh,
                           preferred_element_type=jnp.float32) * scale  # (Bb,T,T)
            s = jnp.where(causal, s, -jnp.inf)

            m = jnp.max(s, axis=-1, keepdims=True)
            p = jnp.exp(s - m)
            denom = jnp.sum(p, axis=-1, keepdims=True)
            pw = p * pl.reciprocal(denom, approx=True)            # EUP reciprocal

            oh = jnp.einsum("bts,bsd->btd", pw, vh,
                            preferred_element_type=jnp.float32)   # (Bb, T, D)
            o_ref[:, :, h * D:(h + 1) * D] = oh.astype(o_ref.dtype)

    return kernel


def multihead_v1(x, wq, wk, wv):
    """x: (B, T, C) f32; wq/wk/wv: (H, C, D) f32 -> (B, T, H*D) f32."""
    B, T, C = x.shape
    H, _, D = wq.shape
    HD = H * D
    scale = float(C) ** -0.5  # matches PyTorch: C (in_size) ** -0.5, not D

    # Fuse the three per-head projections into one (C, 3*H*D) weight:
    # columns [0:HD) = Q (heads concatenated), [HD:2HD) = K, [2HD:3HD) = V.
    wqkv = jnp.concatenate(
        [jnp.transpose(wq, (1, 0, 2)).reshape(C, HD),
         jnp.transpose(wk, (1, 0, 2)).reshape(C, HD),
         jnp.transpose(wv, (1, 0, 2)).reshape(C, HD)],
        axis=-1)                                                  # (C, 3*H*D)

    # Process the whole (small) batch in one grid step; B*T rows amortize the
    # per-step overhead and produce a single DMA of x and a single output tile.
    Bb = B
    grid = (pl.cdiv(B, Bb),)

    kernel = _make_mha_kernel(H, D, scale)
    return pl.pallas_call(
        kernel,
        out_shape=jax.ShapeDtypeStruct((B, T, HD), jnp.float32),
        grid_spec=pltpu.PrefetchScalarGridSpec(
            num_scalar_prefetch=0,
            grid=grid,
            in_specs=[
                pl.BlockSpec((Bb, T, C), lambda i: (i, 0, 0)),
                pl.BlockSpec((C, 3 * HD), lambda i: (0, 0)),
            ],
            out_specs=pl.BlockSpec((Bb, T, HD), lambda i: (i, 0, 0)),
        ),
        compiler_params=pltpu.CompilerParams(
            dimension_semantics=("parallel",)),
    )(x, wqkv)


def _reference(x, wq, wk, wv):
    """Pure-JAX reference matching the PyTorch MultiHeadV1 semantics."""
    B, T, C = x.shape
    H, _, D = wq.shape
    tril = jnp.tril(jnp.ones((T, T), dtype=bool))
    outs = []
    for h in range(H):
        q = x @ wq[h]
        k = x @ wk[h]
        v = x @ wv[h]
        s = jnp.einsum("btd,bsd->bts", q, k) * (C ** -0.5)
        s = jnp.where(tril[None], s, -jnp.inf)
        w = jax.nn.softmax(s, axis=-1)
        outs.append(jnp.einsum("bts,bsd->btd", w, v))
    return jnp.concatenate(outs, axis=-1)


if __name__ == "__main__":
    # Module-consistent shapes: in_size=32, out_size=16, block_size=8,
    # num_heads=4, batch=2, seq len T = block_size = 8.
    B, T, C, D, H = 2, 8, 32, 16, 4

    key = jax.random.PRNGKey(0)
    kx, kq, kk, kv = jax.random.split(key, 4)
    x = jax.random.normal(kx, (B, T, C), dtype=jnp.float32)
    # Equivalent to nn.Linear(in, out, bias=False).weight.T per head.
    wq = jax.random.normal(kq, (H, C, D), dtype=jnp.float32) * 0.1
    wk = jax.random.normal(kk, (H, C, D), dtype=jnp.float32) * 0.1
    wv = jax.random.normal(kv, (H, C, D), dtype=jnp.float32) * 0.1

    out = jax.block_until_ready(multihead_v1(x, wq, wk, wv))
    ref = _reference(x, wq, wk, wv)
    assert out.shape == (B, T, H * D)
    # Tolerance covers the approximate EUP reciprocal used for softmax norm.
    assert jnp.allclose(out, ref, atol=5e-3, rtol=5e-3), float(
        jnp.max(jnp.abs(out - ref)))
    print("KERNEL_OK")
</pallas_src>

<mosaic_0001>
module attributes {stable_mosaic.version = 11 : i64} {
  func.func @kernel(%arg0: i32, %arg1: memref<2x8x32xf32, #tpu.memory_space<vmem>>, %arg2: memref<32x192xf32, #tpu.memory_space<vmem>>, %arg3: memref<2x8x64xf32, #tpu.memory_space<vmem>>) attributes {dimension_semantics = [#tpu.dimension_semantics<parallel>], iteration_bounds = array<i64: 1>, scalar_prefetch = 0 : i64, scratch_operands = 0 : i64, tpu.core_type = #tpu.core_type<tc>, window_params = [{transform_indices = @transform_0, window_bounds = array<i64: 2, 8, 32>}, {pipeline_mode = #tpu.pipeline_mode<synchronous>, transform_indices = @transform_1, window_bounds = array<i64: 32, 192>}, {transform_indices = @transform_2, window_bounds = array<i64: 2, 8, 64>}]} {
    %c0 = arith.constant 0 : index
    %c0_0 = arith.constant 0 : index
    %c0_1 = arith.constant 0 : index
    %0 = vector.load %arg1[%c0, %c0_0, %c0_1] : memref<2x8x32xf32, #tpu.memory_space<vmem>>, vector<2x8x32xf32>
    %c0_2 = arith.constant 0 : index
    %c0_3 = arith.constant 0 : index
    %1 = vector.load %arg2[%c0_2, %c0_3] : memref<32x192xf32, #tpu.memory_space<vmem>>, vector<32x192xf32>
    %2 = vector.shape_cast %1 : vector<32x192xf32> to vector<1x32x192xf32>
    %3 = vector.shape_cast %2 : vector<1x32x192xf32> to vector<1x32x192xf32>
    %4 = vector.broadcast %3 : vector<1x32x192xf32> to vector<2x32x192xf32>
    "tpu.trace_start"() <{level = 10 : i32, message = "btc,bcn->btn"}> : () -> ()
    %cst = arith.constant dense<0.000000e+00> : vector<2x8x192xf32>
    %5 = tpu.matmul %0, %4, %cst {dimension_numbers = #tpu.dot_dimension_numbers<[2], [1], [1], [2], [0, 0, 0, 1, 1, 2], [0], [0]>} : vector<2x8x32xf32>, vector<2x32x192xf32>, vector<2x8x192xf32> -> vector<2x8x192xf32>
    "tpu.trace_stop"() : () -> ()
    %6 = tpu.iota {dimensions = array<i32: 0>} : vector<8x8xi32>
    %7 = tpu.iota {dimensions = array<i32: 1>} : vector<8x8xi32>
    %8 = arith.cmpi sge, %6, %7 : vector<8x8xi32>
    %9 = vector.shape_cast %8 : vector<8x8xi1> to vector<1x8x8xi1>
    %10 = vector.extract_strided_slice %5 {offsets = [0, 0, 0], sizes = [2, 8, 16], strides = [1, 1, 1]} : vector<2x8x192xf32> to vector<2x8x16xf32>
    %11 = vector.extract_strided_slice %5 {offsets = [0, 0, 64], sizes = [2, 8, 16], strides = [1, 1, 1]} : vector<2x8x192xf32> to vector<2x8x16xf32>
    %12 = vector.extract_strided_slice %5 {offsets = [0, 0, 128], sizes = [2, 8, 16], strides = [1, 1, 1]} : vector<2x8x192xf32> to vector<2x8x16xf32>
    "tpu.trace_start"() <{level = 10 : i32, message = "btd,bsd->bts"}> : () -> ()
    %cst_4 = arith.constant dense<0.000000e+00> : vector<2x8x8xf32>
    %13 = tpu.matmul %10, %11, %cst_4 {dimension_numbers = #tpu.dot_dimension_numbers<[2], [2], [1], [1], [0, 0, 0, 1, 1, 1], [0], [0]>} : vector<2x8x16xf32>, vector<2x8x16xf32>, vector<2x8x8xf32> -> vector<2x8x8xf32>
    "tpu.trace_stop"() : () -> ()
    %cst_5 = arith.constant 0.176776692 : f32
    %14 = vector.broadcast %cst_5 : f32 to vector<2x8x8xf32>
    %15 = arith.mulf %13, %14 : vector<2x8x8xf32>
    %cst_6 = arith.constant 0xFF800000 : f32
    %16 = vector.shape_cast %9 : vector<1x8x8xi1> to vector<1x8x8xi1>
    %17 = vector.broadcast %16 : vector<1x8x8xi1> to vector<2x8x8xi1>
    %18 = vector.broadcast %cst_6 : f32 to vector<2x8x8xf32>
    %19 = arith.select %17, %15, %18 : vector<2x8x8xi1>, vector<2x8x8xf32>
    %cst_7 = arith.constant dense<0xFF800000> : vector<2x8xf32>
    %20 = vector.multi_reduction <maximumf>, %19, %cst_7 [2] : vector<2x8x8xf32> to vector<2x8xf32>
    %21 = vector.shape_cast %20 : vector<2x8xf32> to vector<2x8x1xf32>
    %22 = vector.broadcast %21 : vector<2x8x1xf32> to vector<2x8x8xf32>
    %23 = arith.subf %19, %22 : vector<2x8x8xf32>
    %24 = math.exp %23 : vector<2x8x8xf32>
    %cst_8 = arith.constant dense<0.000000e+00> : vector<2x8xf32>
    %25 = vector.multi_reduction <add>, %24, %cst_8 [2] : vector<2x8x8xf32> to vector<2x8xf32>
    %26 = vector.shape_cast %25 : vector<2x8xf32> to vector<2x8x1xf32>
    %27 = tpu.reciprocal %26 {approx = true} : vector<2x8x1xf32> -> vector<2x8x1xf32>
    %28 = vector.broadcast %27 : vector<2x8x1xf32> to vector<2x8x8xf32>
    %29 = arith.mulf %24, %28 : vector<2x8x8xf32>
    "tpu.trace_start"() <{level = 10 : i32, message = "bts,bsd->btd"}> : () -> ()
    %cst_9 = arith.constant dense<0.000000e+00> : vector<2x8x16xf32>
    %30 = tpu.matmul %29, %12, %cst_9 {dimension_numbers = #tpu.dot_dimension_numbers<[2], [1], [1], [2], [0, 0, 0, 1, 1, 2], [0], [0]>} : vector<2x8x8xf32>, vector<2x8x16xf32>, vector<2x8x16xf32> -> vector<2x8x16xf32>
    "tpu.trace_stop"() : () -> ()
    %c0_10 = arith.constant 0 : index
    %c0_11 = arith.constant 0 : index
    %c0_12 = arith.constant 0 : index
    %31 = vector.load %arg3[%c0_10, %c0_11, %c0_12] : memref<2x8x64xf32, #tpu.memory_space<vmem>>, vector<2x8x16xf32>
    tpu.vector_store %arg3[%c0_10, %c0_11, %c0_12], %30 {strides = array<i32>} : memref<2x8x64xf32, #tpu.memory_space<vmem>>, vector<2x8x16xf32>,
    %32 = vector.extract_strided_slice %5 {offsets = [0, 0, 16], sizes = [2, 8, 16], strides = [1, 1, 1]} : vector<2x8x192xf32> to vector<2x8x16xf32>
    %33 = vector.extract_strided_slice %5 {offsets = [0, 0, 80], sizes = [2, 8, 16], strides = [1, 1, 1]} : vector<2x8x192xf32> to vector<2x8x16xf32>
    %34 = vector.extract_strided_slice %5 {offsets = [0, 0, 144], sizes = [2, 8, 16], strides = [1, 1, 1]} : vector<2x8x192xf32> to vector<2x8x16xf32>
    "tpu.trace_start"() <{level = 10 : i32, message = "btd,bsd->bts"}> : () -> ()
    %cst_13 = arith.constant dense<0.000000e+00> : vector<2x8x8xf32>
    %35 = tpu.matmul %32, %33, %cst_13 {dimension_numbers = #tpu.dot_dimension_numbers<[2], [2], [1], [1], [0, 0, 0, 1, 1, 1], [0], [0]>} : vector<2x8x16xf32>, vector<2x8x16xf32>, vector<2x8x8xf32> -> vector<2x8x8xf32>
    "tpu.trace_stop"() : () -> ()
    %cst_14 = arith.constant 0.176776692 : f32
    %36 = vector.broadcast %cst_14 : f32 to vector<2x8x8xf32>
    %37 = arith.mulf %35, %36 : vector<2x8x8xf32>
    %cst_15 = arith.constant 0xFF800000 : f32
    %38 = vector.shape_cast %9 : vector<1x8x8xi1> to vector<1x8x8xi1>
    %39 = vector.broadcast %38 : vector<1x8x8xi1> to vector<2x8x8xi1>
    %40 = vector.broadcast %cst_15 : f32 to vector<2x8x8xf32>
    %41 = arith.select %39, %37, %40 : vector<2x8x8xi1>, vector<2x8x8xf32>
    %cst_16 = arith.constant dense<0xFF800000> : vector<2x8xf32>
    %42 = vector.multi_reduction <maximumf>, %41, %cst_16 [2] : vector<2x8x8xf32> to vector<2x8xf32>
    %43 = vector.shape_cast %42 : vector<2x8xf32> to vector<2x8x1xf32>
    %44 = vector.broadcast %43 : vector<2x8x1xf32> to vector<2x8x8xf32>
    %45 = arith.subf %41, %44 : vector<2x8x8xf32>
    %46 = math.exp %45 : vector<2x8x8xf32>
    %cst_17 = arith.constant dense<0.000000e+00> : vector<2x8xf32>
    %47 = vector.multi_reduction <add>, %46, %cst_17 [2] : vector<2x8x8xf32> to vector<2x8xf32>
    %48 = vector.shape_cast %47 : vector<2x8xf32> to vector<2x8x1xf32>
    %49 = tpu.reciprocal %48 {approx = true} : vector<2x8x1xf32> -> vector<2x8x1xf32>
    %50 = vector.broadcast %49 : vector<2x8x1xf32> to vector<2x8x8xf32>
    %51 = arith.mulf %46, %50 : vector<2x8x8xf32>
    "tpu.trace_start"() <{level = 10 : i32, message = "bts,bsd->btd"}> : () -> ()
    %cst_18 = arith.constant dense<0.000000e+00> : vector<2x8x16xf32>
    %52 = tpu.matmul %51, %34, %cst_18 {dimension_numbers = #tpu.dot_dimension_numbers<[2], [1], [1], [2], [0, 0, 0, 1, 1, 2], [0], [0]>} : vector<2x8x8xf32>, vector<2x8x16xf32>, vector<2x8x16xf32> -> vector<2x8x16xf32>
    "tpu.trace_stop"() : () -> ()
    %c0_19 = arith.constant 0 : index
    %c0_20 = arith.constant 0 : index
    %c16 = arith.constant 16 : index
    %53 = vector.load %arg3[%c0_19, %c0_20, %c16] : memref<2x8x64xf32, #tpu.memory_space<vmem>>, vector<2x8x16xf32>
    tpu.vector_store %arg3[%c0_19, %c0_20, %c16], %52 {strides = array<i32>} : memref<2x8x64xf32, #tpu.memory_space<vmem>>, vector<2x8x16xf32>,
    %54 = vector.extract_strided_slice %5 {offsets = [0, 0, 32], sizes = [2, 8, 16], strides = [1, 1, 1]} : vector<2x8x192xf32> to vector<2x8x16xf32>
    %55 = vector.extract_strided_slice %5 {offsets = [0, 0, 96], sizes = [2, 8, 16], strides = [1, 1, 1]} : vector<2x8x192xf32> to vector<2x8x16xf32>
    %56 = vector.extract_strided_slice %5 {offsets = [0, 0, 160], sizes = [2, 8, 16], strides = [1, 1, 1]} : vector<2x8x192xf32> to vector<2x8x16xf32>
    "tpu.trace_start"() <{level = 10 : i32, message = "btd,bsd->bts"}> : () -> ()
    %cst_21 = arith.constant dense<0.000000e+00> : vector<2x8x8xf32>
    %57 = tpu.matmul %54, %55, %cst_21 {dimension_numbers = #tpu.dot_dimension_numbers<[2], [2], [1], [1], [0, 0, 0, 1, 1, 1], [0], [0]>} : vector<2x8x16xf32>, vector<2x8x16xf32>, vector<2x8x8xf32> -> vector<2x8x8xf32>
    "tpu.trace_stop"() : () -> ()
    %cst_22 = arith.constant 0.176776692 : f32
    %58 = vector.broadcast %cst_22 : f32 to vector<2x8x8xf32>
    %59 = arith.mulf %57, %58 : vector<2x8x8xf32>
    %cst_23 = arith.constant 0xFF800000 : f32
    %60 = vector.shape_cast %9 : vector<1x8x8xi1> to vector<1x8x8xi1>
    %61 = vector.broadcast %60 : vector<1x8x8xi1> to vector<2x8x8xi1>
    %62 = vector.broadcast %cst_23 : f32 to vector<2x8x8xf32>
    %63 = arith.select %61, %59, %62 : vector<2x8x8xi1>, vector<2x8x8xf32>
    %cst_24 = arith.constant dense<0xFF800000> : vector<2x8xf32>
    %64 = vector.multi_reduction <maximumf>, %63, %cst_24 [2] : vector<2x8x8xf32> to vector<2x8xf32>
    %65 = vector.shape_cast %64 : vector<2x8xf32> to vector<2x8x1xf32>
    %66 = vector.broadcast %65 : vector<2x8x1xf32> to vector<2x8x8xf32>
    %67 = arith.subf %63, %66 : vector<2x8x8xf32>
    %68 = math.exp %67 : vector<2x8x8xf32>
    %cst_25 = arith.constant dense<0.000000e+00> : vector<2x8xf32>
    %69 = vector.multi_reduction <add>, %68, %cst_25 [2] : vector<2x8x8xf32> to vector<2x8xf32>
    %70 = vector.shape_cast %69 : vector<2x8xf32> to vector<2x8x1xf32>
    %71 = tpu.reciprocal %70 {approx = true} : vector<2x8x1xf32> -> vector<2x8x1xf32>
    %72 = vector.broadcast %71 : vector<2x8x1xf32> to vector<2x8x8xf32>
    %73 = arith.mulf %68, %72 : vector<2x8x8xf32>
    "tpu.trace_start"() <{level = 10 : i32, message = "bts,bsd->btd"}> : () -> ()
    %cst_26 = arith.constant dense<0.000000e+00> : vector<2x8x16xf32>
    %74 = tpu.matmul %73, %56, %cst_26 {dimension_numbers = #tpu.dot_dimension_numbers<[2], [1], [1], [2], [0, 0, 0, 1, 1, 2], [0], [0]>} : vector<2x8x8xf32>, vector<2x8x16xf32>, vector<2x8x16xf32> -> vector<2x8x16xf32>
    "tpu.trace_stop"() : () -> ()
    %c0_27 = arith.constant 0 : index
    %c0_28 = arith.constant 0 : index
    %c32 = arith.constant 32 : index
    %75 = vector.load %arg3[%c0_27, %c0_28, %c32] : memref<2x8x64xf32, #tpu.memory_space<vmem>>, vector<2x8x16xf32>
    tpu.vector_store %arg3[%c0_27, %c0_28, %c32], %74 {strides = array<i32>} : memref<2x8x64xf32, #tpu.memory_space<vmem>>, vector<2x8x16xf32>,
    %76 = vector.extract_strided_slice %5 {offsets = [0, 0, 48], sizes = [2, 8, 16], strides = [1, 1, 1]} : vector<2x8x192xf32> to vector<2x8x16xf32>
    %77 = vector.extract_strided_slice %5 {offsets = [0, 0, 112], sizes = [2, 8, 16], strides = [1, 1, 1]} : vector<2x8x192xf32> to vector<2x8x16xf32>
    %78 = vector.extract_strided_slice %5 {offsets = [0, 0, 176], sizes = [2, 8, 16], strides = [1, 1, 1]} : vector<2x8x192xf32> to vector<2x8x16xf32>
    "tpu.trace_start"() <{level = 10 : i32, message = "btd,bsd->bts"}> : () -> ()
    %cst_29 = arith.constant dense<0.000000e+00> : vector<2x8x8xf32>
    %79 = tpu.matmul %76, %77, %cst_29 {dimension_numbers = #tpu.dot_dimension_numbers<[2], [2], [1], [1], [0, 0, 0, 1, 1, 1], [0], [0]>} : vector<2x8x16xf32>, vector<2x8x16xf32>, vector<2x8x8xf32> -> vector<2x8x8xf32>
    "tpu.trace_stop"() : () -> ()
    %cst_30 = arith.constant 0.176776692 : f32
    %80 = vector.broadcast %cst_30 : f32 to vector<2x8x8xf32>
    %81 = arith.mulf %79, %80 : vector<2x8x8xf32>
    %cst_31 = arith.constant 0xFF800000 : f32
    %82 = vector.shape_cast %9 : vector<1x8x8xi1> to vector<1x8x8xi1>
    %83 = vector.broadcast %82 : vector<1x8x8xi1> to vector<2x8x8xi1>
    %84 = vector.broadcast %cst_31 : f32 to vector<2x8x8xf32>
    %85 = arith.select %83, %81, %84 : vector<2x8x8xi1>, vector<2x8x8xf32>
    %cst_32 = arith.constant dense<0xFF800000> : vector<2x8xf32>
    %86 = vector.multi_reduction <maximumf>, %85, %cst_32 [2] : vector<2x8x8xf32> to vector<2x8xf32>
    %87 = vector.shape_cast %86 : vector<2x8xf32> to vector<2x8x1xf32>
    %88 = vector.broadcast %87 : vector<2x8x1xf32> to vector<2x8x8xf32>
    %89 = arith.subf %85, %88 : vector<2x8x8xf32>
    %90 = math.exp %89 : vector<2x8x8xf32>
    %cst_33 = arith.constant dense<0.000000e+00> : vector<2x8xf32>
    %91 = vector.multi_reduction <add>, %90, %cst_33 [2] : vector<2x8x8xf32> to vector<2x8xf32>
    %92 = vector.shape_cast %91 : vector<2x8xf32> to vector<2x8x1xf32>
    %93 = tpu.reciprocal %92 {approx = true} : vector<2x8x1xf32> -> vector<2x8x1xf32>
    %94 = vector.broadcast %93 : vector<2x8x1xf32> to vector<2x8x8xf32>
    %95 = arith.mulf %90, %94 : vector<2x8x8xf32>
    "tpu.trace_start"() <{level = 10 : i32, message = "bts,bsd->btd"}> : () -> ()
    %cst_34 = arith.constant dense<0.000000e+00> : vector<2x8x16xf32>
    %96 = tpu.matmul %95, %78, %cst_34 {dimension_numbers = #tpu.dot_dimension_numbers<[2], [1], [1], [2], [0, 0, 0, 1, 1, 2], [0], [0]>} : vector<2x8x8xf32>, vector<2x8x16xf32>, vector<2x8x16xf32> -> vector<2x8x16xf32>
    "tpu.trace_stop"() : () -> ()
    %c0_35 = arith.constant 0 : index
    %c0_36 = arith.constant 0 : index
    %c48 = arith.constant 48 : index
    %97 = vector.load %arg3[%c0_35, %c0_36, %c48] : memref<2x8x64xf32, #tpu.memory_space<vmem>>, vector<2x8x16xf32>
    tpu.vector_store %arg3[%c0_35, %c0_36, %c48], %96 {strides = array<i32>} : memref<2x8x64xf32, #tpu.memory_space<vmem>>, vector<2x8x16xf32>,
    return
  }
  func.func @transform_0(%arg0: i32) -> (i32, i32, i32) {
    %c0_i32 = arith.constant 0 : i32
    %c0_i32_0 = arith.constant 0 : i32
    %c0_i32_1 = arith.constant 0 : i32
    return %arg0, %c0_i32, %c0_i32_0 : i32, i32, i32
  }
  func.func @transform_1(%arg0: i32) -> (i32, i32) {
    %c0_i32 = arith.constant 0 : i32
    %c0_i32_0 = arith.constant 0 : i32
    %c0_i32_1 = arith.constant 0 : i32
    return %c0_i32, %c0_i32_0 : i32, i32
  }
  func.func @transform_2(%arg0: i32) -> (i32, i32, i32) {
    %c0_i32 = arith.constant 0 : i32
    %c0_i32_0 = arith.constant 0 : i32
    %c0_i32_1 = arith.constant 0 : i32
    return %arg0, %c0_i32, %c0_i32_0 : i32, i32, i32
  }
}

</mosaic_0001>

<bundles_post_ra>
// kernel: tpu_custom_call.1
= control target key start
LH: loop header
LB: loop body
LE: loop exit
PB: predicated region body
PF: predicated region fallthrough
CT: control target
= control target key end

     0   :  { %7 = vsyncpa [#allocation3], 0  ;;  %s2062_s0 = inlined_call_operand.hbm [shape: f32[2,8,32], index: 0, kind: input, shape index: {}]   ;;  %s2063_s1 = inlined_call_operand.hbm [shape: f32[32,192], index: 1, kind: input, shape index: {}]   ;;  %s2064_s2 = inlined_call_operand.hbm [shape: f32[2,8,64], index: 2, kind: output, shape index: {}]  }
   0x1   :  { %8 = vsyncpa [#allocation6], 0 }
   0x2   :  { %9 = vsyncpa [#allocation4], 0  ;;  %s1842_s9 = smov [#allocation2]  }
   0x3   :  { %s15_s10 = sshll.u32 %s1842_s9, 4  ;;  %s16_s10 = int_to_ptr.vmem [resolvable:$true] %s15_s10 }
   0x4   :  { %s1784_s11 = scalar_lea.vmem %s16_s10, 256  ;;  %p1789_p1 = scmp.lt.s32.totalorder %s16_s10, %s16_s10 }
   0x5   :  { %p1785_p0 = scmp.ne.s32.totalorder %s16_s10, %s1784_s11  ;;  %p1790_p2 = scmp.lt.s32.totalorder %s1784_s11, %s1784_s11 }
   0x7   :  { %p1791_p3 = por %p1790_p2, %p1789_p1 }
   0x9   :  { %p1792_p4 = pnand %p1791_p3, %p1785_p0 }
   0xb   :  { %1795 = shalt.err (!%p1792_p4)
}
   0xc   :  { %s1843_s12 = smov 128   ;;  %s1844_s13 = smov 8  }
   0xd   :  { %21 = dma.hbm_to_vmem [thread:$0]  %s2062_s0, 256, %s16_s10, [#allocation3], %s1843_s12, %s1843_s12, %s1844_s13  }
   0xe   :  { %s1845_s16 = smov [#allocation5]  }
   0xf   :  { %s27_s17 = sshll.u32 %s1845_s16, 4  ;;  %s28_s17 = int_to_ptr.vmem [resolvable:$true] %s27_s17 }
  0x10   :  { %s1804_s18 = scalar_lea.vmem %s28_s17, 1024  ;;  %p1809_p6 = scmp.lt.s32.totalorder %s28_s17, %s28_s17 }
  0x11   :  { %p1805_p5 = scmp.ne.s32.totalorder %s28_s17, %s1804_s18  ;;  %p1810_p7 = scmp.lt.s32.totalorder %s1804_s18, %s1804_s18 }
  0x13   :  { %p1811_p8 = por %p1810_p7, %p1809_p6 }
  0x15   :  { %p1812_p9 = pnand %p1811_p8, %p1805_p5 }
  0x17   :  { %1815 = shalt.err (!%p1812_p9)
}
  0x18   :  { %s1846_s19 = smov 256   ;;  %s1847_s20 = smov 16  }
  0x19   :  { %33 = dma.hbm_to_vmem [thread:$0]  %s2063_s1, 1024, %s28_s17, [#allocation6], %s1846_s19, %s1846_s19, %s1847_s20  }
  0x1a   :  { %1836 = dma.done.wait [#allocation3], 256  }
  0x1b   :  { %1837 = vsyncadd [#allocation3], 4294967040 }
  0x1c   :  { %1838 = dma.done.wait [#allocation6], 1024  }
  0x1d   :  { %1839 = vsyncadd [#allocation6], 4294966272  ;;  %v1848_v0 = vmov 0.0   ;;  %v49_v1 = vld [vmem:[#allocation5 + $0x38] sm:$0xff]  ;;  %v48_v2 = vld [vmem:[#allocation5 + $0x30] sm:$0xff]  ;;  %vm50_vm0 = vcmask 261120   ;;  %v199_v17 = vlaneseq }
  0x1e   :  { %118 = vmatprep.mubr.f32.mxu0 %v1848_v0  ;;  %192 = vmatprep.mubr.f32.mxu1 %v1848_v0  ;;  %v47_v3 = vld [vmem:[#allocation5 + $0x28] sm:$0xff]  ;;  %v46_v4 = vld [vmem:[#allocation5 + $0x20] sm:$0xff]  ;;  %v45_v5 = vld [vmem:[#allocation5 + $0x18] sm:$0xff]  ;;  %vm1849_vm1 = vmmov 0   ;;  %s1850_s0 = smov 64   ;;  %vm207_vm2 = vcmask 130048  }
  0x1f   :  { %78 = vmatprep.subr.mxu0 %v49_v1  ;;  %152 = vmatprep.subr.mxu1 %v49_v1  ;;  %v44_v6 = vld [vmem:[#allocation5 + $0x10] sm:$0xff]  ;;  %v43_v7 = vld [vmem:[#allocation5 + $0x8] sm:$0xff]  ;;  %v42_v8 = vld [vmem:[#allocation5] sm:$0xff]  ;;  %v200_v18 = vshrl.u32 %v199_v17, 7  ;;  %v202_v19 = vand.u32 127, %v199_v17  ;;  %vm365_vm4 = vcmask 64512  }
  0x20   :  { %79 = vmatpush1.msra.mxu0 %v48_v2  ;;  %153 = vmatpush1.msra.mxu1 %v48_v2  ;;  %v40_v9 = vld [vmem:[#allocation2] sm:$0xff]  ;;  %v41_v10 = vld [vmem:[#allocation2 + $0x8] sm:$0xff]  ;;  %s1851_s1 = smov 48   ;;  %s1852_s23 = smov 112   ;;  %vm880_vm5 = vcmask 261248   ;;  %vm1225_vm6 = vcmask 392448  }
  0x21   :  { %80 = vmatprep.subr.mxu0 %v47_v3  ;;  %154 = vmatprep.subr.mxu1 %v47_v3  ;;  %vm1916_vm3 = vcmp.ge.s32.totalorder %v200_v18, %v202_v19  ;;  %s1853_s24 = smov 32   ;;  %s1854_s25 = smov 96   ;;  %vm1570_vm7 = vcmask 523648  }
  0x22   :  { %81 = vmatpush1.msra.mxu0 %v46_v4  ;;  %155 = vmatpush1.msra.mxu1 %v46_v4  ;;  %s1855_s26 = smov 80   ;;  %s1856_s27 = smov [#allocation7]  }
  0x23   :  { %82 = vmatprep.subr.mxu0 %v45_v5  ;;  %156 = vmatprep.subr.mxu1 %v45_v5  ;;  %s1578_s28 = sshll.u32 %s1856_s27, 4  ;;  %s1579_s28 = int_to_ptr.vmem [resolvable:$true] %s1578_s28 }
  0x24   :  { %83 = vmatpush1.msra.mxu0 %v44_v6  ;;  %157 = vmatpush1.msra.mxu1 %v44_v6  ;;  %s1816_s29 = scalar_lea.vmem %s1579_s28, 256  ;;  %p1821_p11 = scmp.lt.s32.totalorder %s1579_s28, %s1579_s28 }
  0x25   :  { %84 = vmatprep.subr.mxu0 %v43_v7  ;;  %158 = vmatprep.subr.mxu1 %v43_v7  ;;  %p1817_p10 = scmp.ne.s32.totalorder %s1579_s28, %s1816_s29  ;;  %p1822_p12 = scmp.lt.s32.totalorder %s1816_s29, %s1816_s29 }
  0x26   :  { %85 = vmatpush1.msra.mxu0 %v42_v8  ;;  %159 = vmatpush1.msra.mxu1 %v42_v8 }
  0x27   :  { %1591 = vmatmul.mubr.msk.f32.vlgmr.msra.gmra.mxu0 %vm50_vm0, %v40_v9  ;;  %1592 = vmatmul.mubr.msk.f32.vlgmr.msra.gmra.mxu1 %vm50_vm0, %v41_v10  ;;  %p1823_p13 = por %p1822_p12, %p1821_p11 }
  0x28   :  { %1649 = vmatprep.subr.mxu0 %v1848_v0  ;;  %1654 = vmatprep.subr.mxu1 %v1848_v0 }
  0x29   :  { %1651 = vmatprep.mubr.msk.f32.mxu0 %vm1849_vm1, %v1848_v0  ;;  %1656 = vmatprep.mubr.msk.f32.mxu1 %vm1849_vm1, %v1848_v0  ;;  %p1824_p0 = pnand %p1823_p13, %p1817_p10 }
  0xe7   :  { %v1890_v11 = vpop.f32.mrf.mxu0  ;;  %v1893_v12 = vpop.f32.mrf.mxu1 }
  0xe8   :  { %205 = vrot.lane.b32.xlu0 %v1890_v11, %s1850_s0 }
  0xe9   :  { %v1898_v14 = vpop.f32.mrf.mxu0  ;;  %v1908_v16 = vpop.f32.mrf.mxu1 }
  0xec   :  { %283 = vrot.lane.b32.xlu0 %v1893_v12, %s1850_s0 }
 0x15a   :  { %v206_v13 = vpop.permute.xlu0 %205 }
 0x15b   :  { %1650 = vmatpush3.xpose.msk.msra.mxu0 %vm207_vm2, %v206_v13 }
 0x15c   :  { %1659 = vmatprep.subr.mxu0 %v1848_v0 }
 0x15e   :  { %1652 = vmatmul.mubr.msk.f32.vlgmr.msra.gmra.mxu0 %vm207_vm2, %v1890_v11  ;;  %v284_v15 = vpop.permute.xlu0 %283 }
 0x15f   :  { %1655 = vmatpush3.xpose.msk.msra.mxu1 %vm207_vm2, %v284_v15  ;;  %1660 = vmatpush3.msra.mxu0 %v1898_v14 }
 0x160   :  { %1664 = vmatprep.subr.mxu1 %v1848_v0  ;;  %1661 = vmatprep.mubr.msk.f32.mxu0 %vm1849_vm1, %v1848_v0 }
 0x161   :  { %1669 = vmatprep.subr.mxu0 %v1848_v0 }
 0x162   :  { %1657 = vmatmul.mubr.msk.f32.vlgmr.msra.gmra.mxu1 %vm207_vm2, %v1893_v12 }
 0x163   :  { %1665 = vmatpush3.msra.mxu1 %v1908_v16  ;;  %1666 = vmatprep.mubr.msk.f32.mxu1 %vm1849_vm1, %v1848_v0 }
 0x164   :  { %1674 = vmatprep.subr.mxu1 %v1848_v0 }
 0x21e   :  { %v278_v20 = vpop.f32.mrf.mxu0 }
 0x21f   :  { %v359_v22 = vmul.f32 0.17677669, %v278_v20 }
 0x220   :  { %v1653_v23 = vpop.f32.mrf.mxu0 }
 0x221   :  { %v363_v24 = vsel %vm1916_vm3, %v359_v22, -inf }
 0x222   :  { %v355_v25 = vpop.f32.mrf.mxu1  ;;  %v366_v26 = vsel %vm365_vm4, %v363_v24, -inf }
 0x223   :  { %v360_v27 = vmul.f32 0.17677669, %v355_v25  ;;  %367 = vmax.xlane.f32.xlu1 %v366_v26 }
 0x224   :  { %v1658_v28 = vpop.f32.mrf.mxu1 }
 0x225   :  { %v364_v29 = vsel %vm1916_vm3, %v360_v27, -inf }
 0x226   :  { %v369_v30 = vsel %vm365_vm4, %v364_v29, -inf }
 0x227   :  { %370 = vmax.xlane.f32.xlu1 %v369_v30 }
 0x238   :  { %538 = vrot.lane.b32.xlu1 %v1890_v11, %s1851_s1 }
 0x23c   :  { %616 = vrot.lane.b32.xlu1 %v1893_v12, %s1851_s1 }
 0x240   :  { %536 = vrot.lane.b32.xlu1 %v1890_v11, %s1852_s23 }
 0x2ac   :  { %v368_v31 = vpop.xlane.xlu1 %367 }
 0x2ad   :  { %v372_v32 = vsub.f32 %v363_v24, %v368_v31 }
 0x2af   :  { %v374_v33 = vmul.f32 1.442695, %v372_v32 }
 0x2b0   :  { %v371_v34 = vpop.xlane.xlu1 %370 }
 0x2b1   :  { %1744 = vpow2.f32 %v374_v33  ;;  %v373_v35 = vsub.f32 %v364_v29, %v371_v34 }
 0x2b3   :  { %v376_v36 = vmul.f32 1.442695, %v373_v35 }
 0x2b4   :  { %v539_v41 = vpop.permute.xlu1 %538 }
 0x2b5   :  { %1746 = vpow2.f32 %v376_v36 }
 0x2b8   :  { %v617_v42 = vpop.permute.xlu1 %616 }
 0x2bc   :  { %v537_v43 = vpop.permute.xlu1 %536 }
 0x2be   :  { %v1745_v37 = vpop.eup %1744 }
 0x2bf   :  { %v378_v38 = vsel %vm365_vm4, %v1745_v37, 0.0 }
 0x2c0   :  { %379 = vadd.xlane.f32.xlu0 %v378_v38 }
 0x2c2   :  { %v1747_v39 = vpop.eup %1746 }
 0x2c3   :  { %v381_v40 = vsel %vm365_vm4, %v1747_v39, 0.0 }
 0x2c4   :  { %382 = vadd.xlane.f32.xlu1 %v381_v40 }
 0x2d5   :  { %614 = vrot.lane.b32.xlu1 %v1893_v12, %s1852_s23 }
 0x349   :  { %v380_v44 = vpop.xlane.xlu0 %379 }
 0x34a   :  { %1748 = vrcp.f32 %v380_v44 }
 0x34d   :  { %v383_v45 = vpop.xlane.xlu1 %382 }
 0x34e   :  { %1750 = vrcp.f32 %v383_v45 }
 0x351   :  { %v615_v50 = vpop.permute.xlu1 %614 }
 0x357   :  { %v1749_v46 = vpop.eup %1748 }
 0x358   :  { %v386_v47 = vmul.f32 %v1749_v46, %v1745_v37 }
 0x35a   :  { %1662 = vmatmul.mubr.msk.f32.vlgmr.msra.gmra.mxu0 %vm365_vm4, %v386_v47 }
 0x35b   :  { %v1751_v48 = vpop.eup %1750  ;;  %1670 = vmatpush3.xpose.msk.msra.mxu0 %vm207_vm2, %v539_v41  ;;  %1671 = vmatprep.mubr.msk.f32.mxu0 %vm1849_vm1, %v1848_v0 }
 0x35c   :  { %v387_v49 = vmul.f32 %v1751_v48, %v1747_v39  ;;  %1679 = vmatprep.subr.mxu0 %v1848_v0 }
 0x35e   :  { %1667 = vmatmul.mubr.msk.f32.vlgmr.msra.gmra.mxu1 %vm365_vm4, %v387_v49  ;;  %1672 = vmatmul.mubr.msk.f32.vlgmr.msra.gmra.mxu0 %vm207_vm2, %v537_v43 }
 0x35f   :  { %1675 = vmatpush3.xpose.msk.msra.mxu1 %vm207_vm2, %v617_v42  ;;  %1676 = vmatprep.mubr.msk.f32.mxu1 %vm1849_vm1, %v1848_v0 }
 0x360   :  { %1684 = vmatprep.subr.mxu1 %v1848_v0  ;;  %1681 = vmatprep.mubr.msk.f32.mxu0 %vm1849_vm1, %v1848_v0 }
 0x362   :  { %1677 = vmatmul.mubr.msk.f32.vlgmr.msra.gmra.mxu1 %vm207_vm2, %v615_v50 }
 0x363   :  { %1686 = vmatprep.mubr.msk.f32.mxu1 %vm1849_vm1, %v1848_v0 }
 0x41a   :  { %v457_v51 = vpop.f32.mrf.mxu0 }
 0x41b   :  { %534 = vst.msk [vmem:[#allocation7] sm:$0xff] %vm207_vm2, %v457_v51 }
 0x41c   :  { %v1663_v52 = vpop.f32.mrf.mxu0 }
 0x41e   :  { %v530_v53 = vpop.f32.mrf.mxu1  ;;  %v610_v54 = vpop.f32.mrf.mxu0 }
 0x41f   :  { %535 = vst.msk [vmem:[#allocation7 + $0x8] sm:$0xff] %vm207_vm2, %v530_v53  ;;  %v692_v55 = vmul.f32 0.17677669, %v610_v54 }
 0x420   :  { %v1668_v56 = vpop.f32.mrf.mxu1  ;;  %v1673_v57 = vpop.f32.mrf.mxu0 }
 0x421   :  { %v694_v58 = vsel %vm1916_vm3, %v692_v55, -inf }
 0x422   :  { %v688_v59 = vpop.f32.mrf.mxu1  ;;  %v696_v60 = vsel %vm365_vm4, %v694_v58, -inf }
 0x423   :  { %v693_v61 = vmul.f32 0.17677669, %v688_v59  ;;  %697 = vmax.xlane.f32.xlu0 %v696_v60 }
 0x424   :  { %v1678_v62 = vpop.f32.mrf.mxu1 }
 0x425   :  { %v695_v63 = vsel %vm1916_vm3, %v693_v61, -inf }
 0x426   :  { %v699_v1 = vsel %vm365_vm4, %v695_v63, -inf }
 0x427   :  { %700 = vmax.xlane.f32.xlu1 %v699_v1 }
 0x438   :  { %963 = vrot.lane.b32.xlu1 %v1893_v12, %s1853_s24 }
 0x439   :  { %719 = vrot.lane.b32.xlu0 %v1898_v14, %s1852_s23 }
 0x43d   :  { %796 = vrot.lane.b32.xlu0 %v1908_v16, %s1852_s23 }
 0x441   :  { %885 = vrot.lane.b32.xlu0 %v1890_v11, %s1853_s24 }
 0x4ac   :  { %v698_v2 = vpop.xlane.xlu0 %697 }
 0x4ad   :  { %v702_v3 = vsub.f32 %v694_v58, %v698_v2 }
 0x4af   :  { %v704_v4 = vmul.f32 1.442695, %v702_v3 }
 0x4b0   :  { %v701_v5 = vpop.xlane.xlu1 %700  ;;  %v720_v6 = vpop.permute.xlu0 %719 }
 0x4b1   :  { %1752 = vpow2.f32 %v704_v4  ;;  %v703_v7 = vsub.f32 %v695_v63, %v701_v5  ;;  %1680 = vmatpush3.msra.mxu0 %v720_v6 }
 0x4b2   :  { %1689 = vmatprep.subr.mxu0 %v1848_v0 }
 0x4b3   :  { %v706_v8 = vmul.f32 1.442695, %v703_v7 }
 0x4b4   :  { %v797_v9 = vpop.permute.xlu0 %796  ;;  %v964_v27 = vpop.permute.xlu1 %963 }
 0x4b5   :  { %1754 = vpow2.f32 %v706_v8  ;;  %1685 = vmatpush3.msra.mxu1 %v797_v9 }
 0x4b6   :  { %1694 = vmatprep.subr.mxu1 %v1848_v0 }
 0x4b8   :  { %v886_v18 = vpop.permute.xlu0 %885 }
 0x4be   :  { %v1753_v10 = vpop.eup %1752 }
 0x4bf   :  { %v708_v13 = vsel %vm365_vm4, %v1753_v10, 0.0 }
 0x4c0   :  { %709 = vadd.xlane.f32.xlu0 %v708_v13 }
 0x4c2   :  { %v1755_v15 = vpop.eup %1754 }
 0x4c3   :  { %v711_v17 = vsel %vm365_vm4, %v1755_v15, 0.0 }
 0x4c4   :  { %712 = vadd.xlane.f32.xlu0 %v711_v17 }
 0x4da   :  { %883 = vrot.lane.b32.xlu0 %v1890_v11, %s1854_s25 }
 0x4de   :  { %961 = vrot.lane.b32.xlu0 %v1893_v12, %s1854_s25 }
 0x549   :  { %v710_v19 = vpop.xlane.xlu0 %709 }
 0x54a   :  { %1756 = vrcp.f32 %v710_v19 }
 0x54d   :  { %v713_v20 = vpop.xlane.xlu0 %712 }
 0x54e   :  { %1758 = vrcp.f32 %v713_v20 }
 0x551   :  { %v884_v25 = vpop.permute.xlu0 %883 }
 0x555   :  { %v962_v28 = vpop.permute.xlu0 %961 }
 0x557   :  { %v1757_v22 = vpop.eup %1756 }
 0x558   :  { %v716_v23 = vmul.f32 %v1757_v22, %v1753_v10 }
 0x55a   :  { %1682 = vmatmul.mubr.msk.f32.vlgmr.msra.gmra.mxu0 %vm365_vm4, %v716_v23 }
 0x55b   :  { %v1759_v24 = vpop.eup %1758  ;;  %1690 = vmatpush3.xpose.msk.msra.mxu0 %vm207_vm2, %v886_v18  ;;  %1691 = vmatprep.mubr.msk.f32.mxu0 %vm1849_vm1, %v1848_v0 }
 0x55c   :  { %v717_v26 = vmul.f32 %v1759_v24, %v1755_v15  ;;  %1699 = vmatprep.subr.mxu0 %v1848_v0 }
 0x55e   :  { %1687 = vmatmul.mubr.msk.f32.vlgmr.msra.gmra.mxu1 %vm365_vm4, %v717_v26  ;;  %1692 = vmatmul.mubr.msk.f32.vlgmr.msra.gmra.mxu0 %vm207_vm2, %v884_v25 }
 0x55f   :  { %1695 = vmatpush3.xpose.msk.msra.mxu1 %vm207_vm2, %v964_v27  ;;  %1696 = vmatprep.mubr.msk.f32.mxu1 %vm1849_vm1, %v1848_v0 }
 0x560   :  { %1704 = vmatprep.subr.mxu1 %v1848_v0  ;;  %1701 = vmatprep.mubr.msk.f32.mxu0 %vm1849_vm1, %v1848_v0 }
 0x562   :  { %1697 = vmatmul.mubr.msk.f32.vlgmr.msra.gmra.mxu1 %vm207_vm2, %v962_v28 }
 0x563   :  { %1706 = vmatprep.mubr.msk.f32.mxu1 %vm1849_vm1, %v1848_v0 }
 0x61a   :  { %v1992_v29 = vpop.f32.mrf.mxu0 }
 0x61c   :  { %v1683_v30 = vpop.f32.mrf.mxu0 }
 0x61e   :  { %v1994_v31 = vpop.f32.mrf.mxu1  ;;  %v957_v32 = vpop.f32.mrf.mxu0 }
 0x61f   :  { %v1039_v33 = vmul.f32 0.17677669, %v957_v32 }
 0x620   :  { %v1688_v34 = vpop.f32.mrf.mxu1  ;;  %v1693_v35 = vpop.f32.mrf.mxu0 }
 0x621   :  { %v1041_v36 = vsel %vm1916_vm3, %v1039_v33, -inf }
 0x622   :  { %v1035_v37 = vpop.f32.mrf.mxu1  ;;  %v1043_v38 = vsel %vm365_vm4, %v1041_v36, -inf }
 0x623   :  { %v1040_v39 = vmul.f32 0.17677669, %v1035_v37  ;;  %1044 = vmax.xlane.f32.xlu0 %v1043_v38 }
 0x624   :  { %v1698_v40 = vpop.f32.mrf.mxu1 }
 0x625   :  { %v1042_v41 = vsel %vm1916_vm3, %v1040_v39, -inf }
 0x626   :  { %v1046_v42 = vsel %vm365_vm4, %v1042_v41, -inf }
 0x627   :  { %1047 = vmax.xlane.f32.xlu1 %v1046_v42 }
 0x638   :  { %1141 = vrot.lane.b32.xlu1 %v1908_v16, %s1854_s25 }
 0x639   :  { %1065 = vrot.lane.b32.xlu0 %v1898_v14, %s1854_s25 }
 0x63c   :  { %1230 = vrot.lane.b32.xlu1 %v1890_v11, %s1847_s20 }
 0x640   :  { %1228 = vrot.lane.b32.xlu1 %v1890_v11, %s1855_s26 }
 0x6ac   :  { %v1045_v43 = vpop.xlane.xlu0 %1044 }
 0x6ad   :  { %v1049_v44 = vsub.f32 %v1041_v36, %v1045_v43 }
 0x6af   :  { %v1051_v45 = vmul.f32 1.442695, %v1049_v44 }
 0x6b0   :  { %v1048_v46 = vpop.xlane.xlu1 %1047  ;;  %v1066_v47 = vpop.permute.xlu0 %1065 }
 0x6b1   :  { %1760 = vpow2.f32 %v1051_v45  ;;  %v1050_v48 = vsub.f32 %v1042_v41, %v1048_v46  ;;  %1700 = vmatpush3.msra.mxu0 %v1066_v47 }
 0x6b2   :  { %1709 = vmatprep.subr.mxu0 %v1848_v0 }
 0x6b3   :  { %v1053_v49 = vmul.f32 1.442695, %v1050_v48 }
 0x6b4   :  { %v1142_v50 = vpop.permute.xlu1 %1141 }
 0x6b5   :  { %1762 = vpow2.f32 %v1053_v49  ;;  %1705 = vmatpush3.msra.mxu1 %v1142_v50 }
 0x6b6   :  { %1714 = vmatprep.subr.mxu1 %v1848_v0 }
 0x6b8   :  { %v1231_v57 = vpop.permute.xlu1 %1230 }
 0x6be   :  { %v1761_v51 = vpop.eup %1760 }
 0x6bf   :  { %v1055_v52 = vsel %vm365_vm4, %v1761_v51, 0.0 }
 0x6c0   :  { %1056 = vadd.xlane.f32.xlu0 %v1055_v52 }
 0x6c2   :  { %v1763_v11 = vpop.eup %1762 }
 0x6c3   :  { %v1058_v53 = vsel %vm365_vm4, %v1763_v11, 0.0 }
 0x6c4   :  { %1059 = vadd.xlane.f32.xlu0 %v1058_v53 }
 0x6da   :  { %1308 = vrot.lane.b32.xlu0 %v1893_v12, %s1847_s20 }
 0x6de   :  { %1306 = vrot.lane.b32.xlu0 %v1893_v12, %s1855_s26  ;;  %v1229_v12 = vpop.permute.xlu1 %1228 }
 0x749   :  { %v1057_v54 = vpop.xlane.xlu0 %1056 }
 0x74a   :  { %1764 = vrcp.f32 %v1057_v54 }
 0x74d   :  { %v1060_v55 = vpop.xlane.xlu0 %1059 }
 0x74e   :  { %1766 = vrcp.f32 %v1060_v55 }
 0x751   :  { %v1309_v60 = vpop.permute.xlu0 %1308 }
 0x755   :  { %v1307_v62 = vpop.permute.xlu0 %1306 }
 0x757   :  { %v1765_v56 = vpop.eup %1764 }
 0x758   :  { %v1063_v58 = vmul.f32 %v1765_v56, %v1761_v51 }
 0x75a   :  { %1702 = vmatmul.mubr.msk.f32.vlgmr.msra.gmra.mxu0 %vm365_vm4, %v1063_v58 }
 0x75b   :  { %v1767_v59 = vpop.eup %1766  ;;  %1710 = vmatpush3.xpose.msk.msra.mxu0 %vm207_vm2, %v1231_v57  ;;  %1711 = vmatprep.mubr.msk.f32.mxu0 %vm1849_vm1, %v1848_v0 }
 0x75c   :  { %v1064_v61 = vmul.f32 %v1767_v59, %v1763_v11  ;;  %1719 = vmatprep.subr.mxu0 %v1848_v0 }
 0x75e   :  { %1707 = vmatmul.mubr.msk.f32.vlgmr.msra.gmra.mxu1 %vm365_vm4, %v1064_v61  ;;  %1712 = vmatmul.mubr.msk.f32.vlgmr.msra.gmra.mxu0 %vm207_vm2, %v1229_v12 }
 0x75f   :  { %1715 = vmatpush3.xpose.msk.msra.mxu1 %vm207_vm2, %v1309_v60  ;;  %1716 = vmatprep.mubr.msk.f32.mxu1 %vm1849_vm1, %v1848_v0 }
 0x760   :  { %1724 = vmatprep.subr.mxu1 %v1848_v0  ;;  %1721 = vmatprep.mubr.msk.f32.mxu0 %vm1849_vm1, %v1848_v0 }
 0x762   :  { %1717 = vmatmul.mubr.msk.f32.vlgmr.msra.gmra.mxu1 %vm207_vm2, %v1307_v62 }
 0x763   :  { %1726 = vmatprep.mubr.msk.f32.mxu1 %vm1849_vm1, %v1848_v0 }
 0x81a   :  { %v1137_v63 = vpop.f32.mrf.mxu0 }
 0x81c   :  { %v1703_v1 = vpop.f32.mrf.mxu0 }
 0x81e   :  { %v1213_v2 = vpop.f32.mrf.mxu1  ;;  %v1302_v3 = vpop.f32.mrf.mxu0 }
 0x81f   :  { %v1384_v4 = vmul.f32 0.17677669, %v1302_v3 }
 0x820   :  { %v1708_v5 = vpop.f32.mrf.mxu1  ;;  %v1713_v6 = vpop.f32.mrf.mxu0 }
 0x821   :  { %v1386_v7 = vsel %vm1916_vm3, %v1384_v4, -inf }
 0x822   :  { %v1380_v8 = vpop.f32.mrf.mxu1  ;;  %v1388_v9 = vsel %vm365_vm4, %v1386_v7, -inf }
 0x823   :  { %v1385_v10 = vmul.f32 0.17677669, %v1380_v8  ;;  %1389 = vmax.xlane.f32.xlu1 %v1388_v9 }
 0x824   :  { %v1718_v13 = vpop.f32.mrf.mxu1 }
 0x825   :  { %v1387_v15 = vsel %vm1916_vm3, %v1385_v10, -inf }
 0x826   :  { %v1391_v0 = vsel %vm365_vm4, %v1387_v15, -inf }
 0x827   :  { %1392 = vmax.xlane.f32.xlu0 %v1391_v0 }
 0x8ac   :  { %v1390_v17 = vpop.xlane.xlu1 %1389 }
 0x8ad   :  { %v1394_v18 = vsub.f32 %v1386_v7, %v1390_v17 }
 0x8af   :  { %v1396_v19 = vmul.f32 1.442695, %v1394_v18 }
 0x8b0   :  { %v1393_v20 = vpop.xlane.xlu0 %1392 }
 0x8b1   :  { %1768 = vpow2.f32 %v1396_v19  ;;  %v1395_v22 = vsub.f32 %v1387_v15, %v1393_v20 }
 0x8b3   :  { %v1398_v23 = vmul.f32 1.442695, %v1395_v22 }
 0x8b5   :  { %1770 = vpow2.f32 %v1398_v23 }
 0x8be   :  { %v1769_v24 = vpop.eup %1768 }
 0x8bf   :  { %v1400_v25 = vsel %vm365_vm4, %v1769_v24, 0.0 }
 0x8c0   :  { %1401 = vadd.xlane.f32.xlu0 %v1400_v25 }
 0x8c2   :  { %v1771_v26 = vpop.eup %1770 }
 0x8c3   :  { %v1403_v27 = vsel %vm365_vm4, %v1771_v26, 0.0 }
 0x8c4   :  { %1404 = vadd.xlane.f32.xlu1 %v1403_v27 }
 0x8d5   :  { %1486 = vrot.lane.b32.xlu1 %v1908_v16, %s1855_s26 }
 0x8d6   :  { %1410 = vrot.lane.b32.xlu0 %v1898_v14, %s1855_s26 }
 0x8d9   :  { %874 = vrot.lane.b32.xlu1 %v1992_v29, %s1847_s20 }
 0x8da   :  { %876 = vrot.lane.b32.xlu0 %v1994_v31, %s1847_s20 }
 0x8dd   :  { %1219 = vrot.lane.b32.xlu1 %v1137_v63, %s1853_s24 }
 0x8de   :  { %1221 = vrot.lane.b32.xlu0 %v1213_v2, %s1853_s24 }
 0x949   :  { %v1402_v21 = vpop.xlane.xlu0 %1401 }
 0x94a   :  { %1772 = vrcp.f32 %v1402_v21 }
 0x94d   :  { %v1411_v28 = vpop.permute.xlu0 %1410  ;;  %v1405_v30 = vpop.xlane.xlu1 %1404 }
 0x94e   :  { %1774 = vrcp.f32 %v1405_v30  ;;  %1720 = vmatpush3.msra.mxu0 %v1411_v28 }
 0x951   :  { %v877_v16 = vpop.permute.xlu0 %876  ;;  %v1487_v32 = vpop.permute.xlu1 %1486 }
 0x952   :  { %882 = vst.msk [vmem:[#allocation7 + $0x8] sm:$0xff] %vm880_vm5, %v877_v16  ;;  %1725 = vmatpush3.msra.mxu1 %v1487_v32 }
 0x955   :  { %v1222_v14 = vpop.permute.xlu0 %1221  ;;  %v875_v29 = vpop.permute.xlu1 %874 }
 0x956   :  { %1227 = vst.msk [vmem:[#allocation7 + $0x8] sm:$0xff] %vm1225_vm6, %v1222_v14 }
 0x957   :  { %881 = vst.msk [vmem:[#allocation7] sm:$0xff] %vm880_vm5, %v875_v29  ;;  %v1773_v31 = vpop.eup %1772 }
 0x958   :  { %v1408_v33 = vmul.f32 %v1773_v31, %v1769_v24 }
 0x959   :  { %v1220_v34 = vpop.permute.xlu1 %1219 }
 0x95a   :  { %1226 = vst.msk [vmem:[#allocation7] sm:$0xff] %vm1225_vm6, %v1220_v34  ;;  %1722 = vmatmul.mubr.msk.f32.vlgmr.msra.gmra.mxu0 %vm365_vm4, %v1408_v33 }
 0x95b   :  { %v1775_v35 = vpop.eup %1774 }
 0x95c   :  { %v1409_v36 = vmul.f32 %v1775_v35, %v1771_v26 }
 0x95e   :  { %1727 = vmatmul.mubr.msk.f32.vlgmr.msra.gmra.mxu1 %vm365_vm4, %v1409_v36 }
 0xa1a   :  { %v1482_v37 = vpop.f32.mrf.mxu0 }
 0xa1b   :  { %1564 = vrot.lane.b32.xlu1 %v1482_v37, %s1851_s1 }
 0xa1c   :  { %v1723_v38 = vpop.f32.mrf.mxu0 }
 0xa1e   :  { %v1558_v39 = vpop.f32.mrf.mxu1 }
 0xa1f   :  { %1566 = vrot.lane.b32.xlu0 %v1558_v39, %s1851_s1 }
 0xa20   :  { %v1728_v40 = vpop.f32.mrf.mxu1 }
 0xa8d   :  { %v1565_v41 = vpop.permute.xlu1 %1564 }
 0xa8e   :  { %1571 = vst.msk [vmem:[#allocation7] sm:$0xff] %vm1570_vm7, %v1565_v41 }
 0xa91   :  { %v1567_v42 = vpop.permute.xlu0 %1566 }
 0xa92   :  { %1572 = vst.msk [vmem:[#allocation7 + $0x8] sm:$0xff] %vm1570_vm7, %v1567_v42 }
 0xa93   :  { %1827 = shalt.err (!%p1824_p0)
}
 0xa94   :  { %1584 = dma.vmem_to_hbm [thread:$0]  %s1579_s28, 256, %s2064_s2, [#allocation4], %s1843_s12, %s1843_s12, %s1844_s13  }
 0xa95   :  { %1840 = dma.done.wait [#allocation4], 256  }
 0xa96   :  { %1841 = vsyncadd [#allocation4], 4294967040 }
 0xa97   :  { %1588 = vsyncpa [#allocation3], 1 }
 0xa98   :  { %1589 = vsyncpa [#allocation6], 1 }
 0xa99   :  { %1590 = vsyncpa [#allocation4], 1 }

</bundles_post_ra>
